<compile_context>
chip_gen: v6e
topology: v6e:2x2x1
jax: 0.10.0
libtpu: 0.0.40
codegen_flags: <defaults>
</compile_context>

<pallas_src>
import jax
import jax.numpy as jnp
from jax.experimental import pallas as pl
from jax.experimental.pallas import tpu as pltpu


def _patch_recovery_kernel(x_ref, w_ref, b_ref, o_ref):
    # x_ref: (TM, Cin), w_ref: (Cin, TN), b_ref: (1, TN), o_ref: (TM, TN)
    acc = jnp.dot(x_ref[...], w_ref[...], preferred_element_type=jnp.float32)
    o_ref[...] = (acc + b_ref[...].astype(jnp.float32)).astype(o_ref.dtype)


def _round_up(x, m):
    return ((x + m - 1) // m) * m


_VMEM_BUDGET = 48 * 1024 * 1024  # per-step, double-buffered; safe on v7x (64 MiB)


def _step_bytes(tm, cin, tn, in_item, w_item, out_item):
    # BlockSpec double-buffers every operand; output tile counted double-buffered too.
    return 2 * ((tm * cin) * in_item + (cin * tn) * w_item + tn * w_item
                + (tm * tn) * out_item)


def _choose_tiles(M, Cin, Npad, in_item, w_item, out_item):
    """Pick (TM, TN).  Prefer TN == Npad (W resident, fetched from HBM once)."""
    tn_candidates = [Npad] + [c for c in (512, 256, 128) if c < Npad]
    for tn in tn_candidates:
        # Big row tiles amortize the ~0.35 us/step overhead; keep >=2 row tiles
        # when M is large enough so v7x megacore can shard the parallel M axis.
        tm = min(1024, _round_up(M, 8))
        if M > 16 and pl.cdiv(M, tm) < 2:
            tm = _round_up(pl.cdiv(M, 2), 8)
        while tm > 8 and _step_bytes(tm, Cin, tn, in_item, w_item, out_item) > _VMEM_BUDGET:
            tm = max(8, _round_up(tm // 2, 8))
        if _step_bytes(tm, Cin, tn, in_item, w_item, out_item) <= _VMEM_BUDGET:
            return tm, tn
    # TODO(synk): for enormous Cin add a K grid axis ("arbitrary", last) with a
    # VMEM f32 accumulator + pl.when init/finalize instead of this last resort.
    return 8, 128


def patch_recovery2d(x, weight, bias, img_size, patch_size, compute_dtype=None):
    """x: (N, Cin, Hin, Win) NCHW; weight: (Cin, Cout, ph, pw); bias: (Cout,)."""
    N, Cin, Hin, Win = x.shape
    ph, pw = patch_size
    Cout = weight.shape[1]
    Nout = ph * pw * Cout
    M = N * Hin * Win
    out_dtype = x.dtype

    # ---- matmul view of the transposed conv (layout glue, plain JAX) ----
    # W columns ordered (i, j, co) so the kernel output reshapes directly to
    # (N, Hin, Win, ph, pw, Cout) -- no patch-vs-channel permute of the big array.
    xm = jnp.transpose(x, (0, 2, 3, 1)).reshape(M, Cin)            # (M, Cin)
    wm = jnp.transpose(weight, (0, 2, 3, 1)).reshape(Cin, Nout)    # (Cin, ph*pw*Cout)
    bm = jnp.tile(bias, ph * pw).reshape(1, Nout)                  # bias[co] per (i,j,co)

    if compute_dtype is not None:                                  # optional bf16 lever
        xm = xm.astype(compute_dtype)
        wm = wm.astype(compute_dtype)

    # ---- tiling ----
    lane = 128 if Nout <= 128 else 256           # 256-wide MXU on v6e/v7x
    Npad = _round_up(Nout, lane)

    in_item = jnp.dtype(xm.dtype).itemsize
    w_item = jnp.dtype(wm.dtype).itemsize
    out_item = jnp.dtype(out_dtype).itemsize

    TM, TN = _choose_tiles(M, Cin, Npad, in_item, w_item, out_item)
    grid_m = pl.cdiv(M, TM)
    M_pad = grid_m * TM
    grid_n = pl.cdiv(Npad, TN)
    Npad = grid_n * TN

    if M_pad != M:
        xm = jnp.pad(xm, ((0, M_pad - M), (0, 0)))
    if Npad != Nout:
        wm = jnp.pad(wm, ((0, 0), (0, Npad - Nout)))
        bm = jnp.pad(bm, ((0, 0), (0, Npad - Nout)))

    w_resident = grid_n == 1
    if w_resident:
        # 1-D grid over M; W/bias block index is constant -> DMA'd from HBM once.
        grid = (grid_m,)
        in_specs = [
            pl.BlockSpec((TM, Cin), lambda i: (i, 0)),
            pl.BlockSpec((Cin, TN), lambda i: (0, 0)),
            pl.BlockSpec((1, TN), lambda i: (0, 0)),
        ]
        out_specs = pl.BlockSpec((TM, TN), lambda i: (i, 0))
        dim_sem = ("parallel",)
        w_refetch = 1
    else:
        # Fallback: column-tile W (huge Cin*Nout).  X block constant over inner j.
        grid = (grid_m, grid_n)
        in_specs = [
            pl.BlockSpec((TM, Cin), lambda i, j: (i, 0)),
            pl.BlockSpec((Cin, TN), lambda i, j: (0, j)),
            pl.BlockSpec((1, TN), lambda i, j: (0, j)),
        ]
        out_specs = pl.BlockSpec((TM, TN), lambda i, j: (i, j))
        dim_sem = ("parallel", "parallel")
        w_refetch = grid_m

    step_b = _step_bytes(TM, Cin, TN, in_item, w_item, out_item)
    vmem_limit = int(min(56 * 2**20, max(32 * 2**20, step_b + (4 << 20))))

    cost = pl.CostEstimate(
        flops=2 * M_pad * Cin * Npad,
        transcendentals=0,
        bytes_accessed=(M_pad * Cin * in_item
                        + w_refetch * Cin * Npad * w_item
                        + Npad * w_item
                        + M_pad * Npad * out_item),
    )

    y = pl.pallas_call(
        _patch_recovery_kernel,
        out_shape=jax.ShapeDtypeStruct((M_pad, Npad), out_dtype),
        grid_spec=pl.GridSpec(
            grid=grid,
            in_specs=in_specs,
            out_specs=out_specs,
        ),
        compiler_params=pltpu.CompilerParams(
            dimension_semantics=dim_sem,
            vmem_limit_bytes=vmem_limit,
        ),
        cost_estimate=cost,
    )(xm, wm, bm)

    # Drop padding, depatchify channels-last, crop BEFORE the final layout change.
    y = y[:M, :Nout].reshape(N, Hin, Win, ph, pw, Cout)
    y = jnp.transpose(y, (0, 1, 3, 2, 4, 5)).reshape(N, Hin * ph, Win * pw, Cout)
    H, W = Hin * ph, Win * pw
    top = (H - img_size[0]) // 2
    left = (W - img_size[1]) // 2
    y = y[:, top:top + img_size[0], left:left + img_size[1], :]
    return jnp.transpose(y, (0, 3, 1, 2)).astype(out_dtype)        # NHWC -> NCHW


def _reference(x, weight, bias, img_size, patch_size):
    # Pure-JAX reference of ConvTranspose2d(kernel=stride=patch) + center crop.
    N, Cin, Hin, Win = x.shape
    ph, pw = patch_size
    Cout = weight.shape[1]
    y = jnp.einsum("nchw,cdij->ndhiwj", x, weight)                 # (N,Cout,Hin,ph,Win,pw)
    y = y.reshape(N, Cout, Hin * ph, Win * pw) + bias[None, :, None, None]
    H, W = Hin * ph, Win * pw
    h_pad, w_pad = H - img_size[0], W - img_size[1]
    top, left = h_pad // 2, w_pad // 2
    return y[:, :, top:H - (h_pad - top), left:W - (w_pad - left)]


if __name__ == "__main__":
    img_size = (14, 14)
    patch_size = (4, 4)
    in_chans = 8
    out_chans = 3
    N, Hin, Win = 2, 4, 4  # latent grid; conv-transpose output is 16x16, cropped to 14x14

    key = jax.random.PRNGKey(0)
    kx, kw, kb = jax.random.split(key, 3)
    x = jax.random.normal(kx, (N, in_chans, Hin, Win), dtype=jnp.float32)
    # nn.ConvTranspose2d weight shape: (in_chans, out_chans, kh, kw)
    weight = jax.random.normal(kw, (in_chans, out_chans, *patch_size), dtype=jnp.float32) * 0.1
    bias = jax.random.normal(kb, (out_chans,), dtype=jnp.float32) * 0.1

    out = patch_recovery2d(x, weight, bias, img_size, patch_size)
    out = jax.block_until_ready(out)

    ref = _reference(x, weight, bias, img_size, patch_size)
    assert out.shape == (N, out_chans, img_size[0], img_size[1]), out.shape
    assert jnp.allclose(out, ref, atol=1e-4, rtol=1e-4), "mismatch vs reference"

    print("KERNEL_OK")
</pallas_src>

<mosaic_0001>
module attributes {stable_mosaic.version = 11 : i64} {
  func.func @_patch_recovery_kernel(%arg0: i32, %arg1: memref<16x8xf32, #tpu.memory_space<vmem>>, %arg2: memref<8x128xf32, #tpu.memory_space<vmem>>, %arg3: memref<1x128xf32, #tpu.memory_space<vmem>>, %arg4: memref<16x128xf32, #tpu.memory_space<vmem>>) attributes {dimension_semantics = [#tpu.dimension_semantics<parallel>], iteration_bounds = array<i64: 2>, scalar_prefetch = 0 : i64, scratch_operands = 0 : i64, tpu.core_type = #tpu.core_type<tc>, window_params = [{transform_indices = @transform_0, window_bounds = array<i64: 16, 8>}, {pipeline_mode = #tpu.pipeline_mode<synchronous>, transform_indices = @transform_1, window_bounds = array<i64: 8, 128>}, {pipeline_mode = #tpu.pipeline_mode<synchronous>, transform_indices = @transform_2, window_bounds = array<i64: 1, 128>}, {transform_indices = @transform_3, window_bounds = array<i64: 16, 128>}]} {
    %c0 = arith.constant 0 : index
    %c0_0 = arith.constant 0 : index
    %0 = vector.load %arg1[%c0, %c0_0] : memref<16x8xf32, #tpu.memory_space<vmem>>, vector<16x8xf32>
    %c0_1 = arith.constant 0 : index
    %c0_2 = arith.constant 0 : index
    %1 = vector.load %arg2[%c0_1, %c0_2] : memref<8x128xf32, #tpu.memory_space<vmem>>, vector<8x128xf32>
    %cst = arith.constant dense<0.000000e+00> : vector<16x128xf32>
    %2 = tpu.matmul %0, %1, %cst {dimension_numbers = #tpu.dot_dimension_numbers<[1], [0], [0], [1], [0, 0, 1, 1], [], []>} : vector<16x8xf32>, vector<8x128xf32>, vector<16x128xf32> -> vector<16x128xf32>
    %c0_3 = arith.constant 0 : index
    %c0_4 = arith.constant 0 : index
    %3 = vector.load %arg3[%c0_3, %c0_4] : memref<1x128xf32, #tpu.memory_space<vmem>>, vector<1x128xf32>
    %4 = vector.broadcast %3 : vector<1x128xf32> to vector<16x128xf32>
    %5 = arith.addf %2, %4 : vector<16x128xf32>
    %c0_5 = arith.constant 0 : index
    %c0_6 = arith.constant 0 : index
    %6 = vector.load %arg4[%c0_5, %c0_6] : memref<16x128xf32, #tpu.memory_space<vmem>>, vector<16x128xf32>
    tpu.vector_store %arg4[%c0_5, %c0_6], %5 {strides = array<i32>} : memref<16x128xf32, #tpu.memory_space<vmem>>, vector<16x128xf32>,
    return
  }
  func.func @transform_0(%arg0: i32) -> (i32, i32) {
    %c0_i32 = arith.constant 0 : i32
    %c0_i32_0 = arith.constant 0 : i32
    return %arg0, %c0_i32 : i32, i32
  }
  func.func @transform_1(%arg0: i32) -> (i32, i32) {
    %c0_i32 = arith.constant 0 : i32
    %c0_i32_0 = arith.constant 0 : i32
    %c0_i32_1 = arith.constant 0 : i32
    return %c0_i32, %c0_i32_0 : i32, i32
  }
  func.func @transform_2(%arg0: i32) -> (i32, i32) {
    %c0_i32 = arith.constant 0 : i32
    %c0_i32_0 = arith.constant 0 : i32
    %c0_i32_1 = arith.constant 0 : i32
    return %c0_i32, %c0_i32_0 : i32, i32
  }
  func.func @transform_3(%arg0: i32) -> (i32, i32) {
    %c0_i32 = arith.constant 0 : i32
    %c0_i32_0 = arith.constant 0 : i32
    return %arg0, %c0_i32 : i32, i32
  }
}

</mosaic_0001>

<bundles_post_ra>
// kernel: tpu_custom_call.1
= control target key start
LH: loop header
LB: loop body
LE: loop exit
PB: predicated region body
PF: predicated region fallthrough
CT: control target
= control target key end

     0   :  { %8 = vsyncpa [#allocation3], 0  ;;  %s599_s0 = inlined_call_operand.vmem [shape: f32[32,8], index: 0, kind: input, shape index: {}]   ;;  %s600_s1 = inlined_call_operand.vmem [shape: f32[8,128], index: 1, kind: input, shape index: {}]   ;;  %s601_s2 = inlined_call_operand.vmem [shape: f32[1,128], index: 2, kind: input, shape index: {}]   ;;  %s602_s3 = inlined_call_operand.hbm [shape: f32[32,128], index: 3, kind: output, shape index: {}]  }
   0x1   :  { %10 = vsyncpa [#allocation3 + $0x1], 0  ;;  %s492_s12 = smov 0   ;;  %s494_s13 = smov 0  }
   0x2   :  { %s496_s14 = smov 0   ;;  %s498_s15 = smov 0  }
   0x3 LB: > { %s513_s16 = sadd.s32 4294967295, %s467_s15   ;;  %s342_s17 = sadd.s32 4294967294, %s467_s15   ;;  %s467_s15 = sphi %s498_s15, %s608_s15   ;;  %s463_s14 = sphi %s496_s14, %s607_s14   ;;  %s459_s13 = sphi %s494_s13, %s606_s13   ;;  %s455_s12 = sphi %s492_s12, %s605_s12  }
   0x4   : > { %s517_s18 = sadd.s32 1, %s467_s15   ;;  %s91_s19 = sadd.s32 1, %s463_s14 }
   0x5   : > { %s88_s20 = ssub.s32 %s467_s15, %s517_s18  ;;  %p101_p0 = scmp.ne.s32.totalorder %s463_s14, %s459_s13 }
   0x6   : > { %p89_p1 = scmp.eq.s32.totalorder %s88_s20, 0  ;;  %p102_p2 = scmp.eq.s32.totalorder %s513_s16, 1 }
   0x7   : > { %p107_p3 = scmp.ne.s32.totalorder %s459_s13, %s455_s12  ;;  %p108_p4 = scmp.eq.s32.totalorder %s342_s17, 1 }
   0x8   : > { %s528_s21 = scalar_select %p89_p1, %s463_s14, %s91_s19  }
   0x9   : > { %p530_p5 = por %p102_p2, %p101_p0  ;;  %p534_p6 = por %p108_p4, %p107_p3 }
   0xa   : > { %p345_p7 = scmp.ge.s32.totalorder %s467_s15, 1  ;;  %p141_p8 = scmp.lt.s32.totalorder %s467_s15, 3 }
   0xc   : > { %p142_p9 = pnand %p345_p7, %p141_p8 }
   0xd   : > { %s347_s26 = sshll.u32 (!%p142_p9), %s513_s16, 1  ;;  %s162_s4 = sand.u32 (!%p142_p9), 1, %s459_s13  }
   0xe   : > { %145 = sbr.rel (%p142_p9) target bundleno = 235 (0xeb), region = 32  ;;  %p166_p10 = scmp.lt.s32.totalorder (!%p142_p9), %s347_s26, 3 }
   0xf   : > { %s346_s5 = sshll.u32 (!%p142_p9), %s162_s4, 4  ;;  %s357_s10 = sshll.u32 (!%p142_p9), %s513_s16, 8 }
  0x10   : > { %s164_s8 = scalar_lea.vmem (!%p142_p9), [#allocation2], %s346_s5  ;;  %s557_s19 = scalar_lea.hbm (!%p142_p9), %s602_s3, %s357_s10 }
  0x11   : > { %s280_s9 = sshll.u32 (!%p142_p9), %s164_s8, 4  ;;  %s559_s20 = scalar_lea.sflag (!%p142_p9), [#allocation3], %s162_s4  ;;  %s552_s9 = int_to_ptr.vmem [resolvable:$true] %s280_s9 }
  0x12   : > { %s407_s24 = scalar_lea.vmem (!%p142_p9), %s552_s9, 256  ;;  %s469_s16 = smov (!%p142_p9), [#allocation2]  }
  0x13   : > { %v174_v0 = vld [vmem:[%s600_s1] sm:$0xff]  ;;  %s610_s26 = smov (!%p166_p10, %s347_s26), 3  ;;  %vm182_vm0 = vcmask 64512   ;;  %p408_p11 = scmp.ne.s32.totalorder %s552_s9, %s407_s24 }
  0x14   : > { %361 = vmatprep.subr.mxu0 %v174_v0  ;;  %s348_s27 = sshll.u32 %s610_s26, 3  ;;  %v349_v3 = vld [vmem:[%s601_s2] ss:$0 sm:$0xff]  ;;  %s411_s25 = sshll.u32 %s469_s16, 4  ;;  %s412_s25 = int_to_ptr.vmem [resolvable:$false] %s411_s25 }
  0x15   : > { %362 = vmatpush3.msra.mxu0 %v174_v0  ;;  %s169_s30 = scalar_lea.vmem %s599_s0, %s348_s27  ;;  %p409_p12 = pnand %p408_p11, %p530_p5 }
  0x16   : > { %v172_v1 = vld [vmem:[%s169_s30] sm:$0xff]  ;;  %v173_v2 = vld [vmem:[%s169_s30 + $0x8] sm:$0xff]  ;;  %s413_s26 = scalar_lea.vmem %s412_s25, 512  ;;  %p414_p0 = scmp.lt.s32.totalorder %s552_s9, %s412_s25 }
  0x17   : > { %363 = vmatprep.mubr.msk.f32.mxu0 %vm182_vm0, %v172_v1  ;;  %p410_p13 = pneg %p409_p12  ;;  %p415_p1 = scmp.lt.s32.totalorder %s413_s26, %s407_s24 }
  0x18   : > { %364 = vmatmul.mubr.msk.f32.vlgmr.msra.gmra.mxu0 %vm182_vm0, %v173_v2 }
  0x19   : > { %p416_p2 = por %p415_p1, %p414_p0 }
  0x1b   : > { %p417_p3 = pnand %p416_p2, %p410_p13 }
  0xd8   : > { %v365_v4 = vpop.f32.mrf.mxu0 }
  0xd9   : > { %v261_v5 = vadd.f32 %v365_v4, %v349_v3 }
  0xda   : > { %v255_v6 = vpop.f32.mrf.mxu0 }
  0xdb   : > { %265 = vst [vmem:[%s164_s8 + $0x8] sm:$0xff] %v261_v5  ;;  %v256_v7 = vadd.f32 %v349_v3, %v255_v6 }
  0xdd   : > { %264 = vst [vmem:[%s164_s8] sm:$0xff] %v256_v7 }
  0xde   : > { %420 = shalt.err (!%p417_p3)
}
  0xdf   : > { %s421_s27 = scalar_lea.hbm %s557_s19, 256  ;;  %s425_s30 = scalar_lea.hbm %s602_s3, 512 }
  0xe0   : > { %p422_p4 = scmp.ne.s32.totalorder %s557_s19, %s421_s27  ;;  %p426_p9 = scmp.lt.s32.totalorder %s557_s19, %s602_s3 }
  0xe1   : > { %p427_p10 = scmp.lt.s32.totalorder %s425_s30, %s421_s27 }
  0xe2   : > { %p423_p7 = pnand %p422_p4, %p530_p5 }
  0xe3   : > { %p428_p11 = por %p427_p10, %p426_p9 }
  0xe4   : > { %p424_p8 = pneg %p423_p7 }
  0xe6   : > { %p429_p12 = pnand %p428_p11, %p424_p8 }
  0xe8   : > { %432 = shalt.err (!%p429_p12)
}
  0xe9   : > { %s470_s6 = smov 128   ;;  %s471_s7 = smov 8  }
  0xea   : > { %366 = dma.vmem_to_hbm [thread:$0]  (%p530_p5), %s552_s9, 256, %s557_s19, %s559_s20, %s470_s6, %s470_s6, %s471_s7  }
  0xeb PF: > { %p372_p13 = scmp.ge.s32.totalorder %s467_s15, 2  ;;  %s295_s8 = sand.u32 1, %s455_s12  }
  0xec   : > { %s296_s10 = scalar_lea.sflag [#allocation3], %s295_s8 }
  0xed   : > { %p369_p0 = pnand %p372_p13, %p534_p6 }
  0xef   : > { %p370_p1 = pneg %p369_p0 }
  0xf1   : > { %450 = dma.done.wait (%p370_p1), %s296_s10, 256  }
  0xf2   : > { %452 = vsyncadd (%p370_p1), %s296_s10, 4294967040  ;;  %p13_p2 = scmp.ge.s32.totalorder %s517_s18, 4   ;;  %s605_s12 = smov %s459_s13 }
  0xf3   : > { %s606_s13 = smov %s463_s14  ;;  %s607_s14 = smov %s528_s21 }
  0xf4   : > { %s608_s15 = smov %s517_s18  ;;  %15 = sbr.rel (!%p13_p2) target bundleno = 3 (0x3), region = 67 }
  0xf9   :  { %301 = vsyncpa [#allocation3], 1 }
  0xfa   :  { %303 = vsyncpa [#allocation3 + $0x1], 1 }

</bundles_post_ra>
